<compile_context>
chip_gen: v5e
topology: v5e:2x2
jax: 0.10.0
libtpu: 0.0.40
codegen_flags: <defaults>
</compile_context>

<pallas_src>
from typing import Dict, List, Any

import jax
import jax.numpy as jnp
from jax.experimental import pallas as pl
from jax.experimental.pallas import tpu as pltpu


# ----------------------------- SplitTensor (JAX) -----------------------------
class SplitTensor:
    """JAX analogue of the PyTorch SplitTensor (channel-grouped NCHW tensor)."""

    def __init__(self, x, groups: Dict[Any, int] = None):
        if groups is not None:
            assert hasattr(x, "shape")
            if sum(groups.values()) != x.shape[1]:
                raise ValueError(f"Got groups {groups} for tensor of shape {x.shape}")
            self.full = x
            self.split = None
            self.num_channels = dict(groups)
        else:
            self.full = None
            self.split = x
            self.num_channels = {k: v.shape[1] for k, v in x.items()}
        self.keys = list(self.num_channels.keys())
        self.start, self.end = {}, {}
        nc = 0
        for key in self.keys:
            prev = nc
            nc += self.num_channels[key]
            self.start[key] = prev
            self.end[key] = nc

    def full_view(self):
        if self.full is None:
            self.full = jnp.concatenate([self.split[k] for k in self.keys], axis=1)
        return self.full

    def diag_view(self):
        if self.split is None:
            self.split = {k: self.full[:, self.start[k]:self.end[k]] for k in self.keys}
        return self.split


class SplitTensorType:
    def __init__(self, groups: Dict[str, int], spatial_shape, complex: bool = False):
        self.groups = dict(groups)
        self.keys = list(sorted(self.groups.keys()))
        self.num_channels = sum(self.groups.values())
        self.spatial_shape = spatial_shape
        self.complex = complex
        self.dtype = jnp.complex64 if complex else jnp.float32


# ------------------------------- Pallas kernel --------------------------------
def _fork_kernel(x_ref, *out_refs):
    # Pure data movement: replicate the current input tile into every output.
    v = x_ref[...]
    for o in out_refs:
        o[...] = v


_LANE = 128
_SUBLANE = 8
_MAX_LANES_PER_ROW = 16384            # 64 KiB per f32 row: plenty for DMA efficiency
_TARGET_TILE_BYTES = 16 * 1024 * 1024  # per-buffer tile target (hides ~0.35us/step)
_MIN_SPLIT_BYTES = 2 * 1024 * 1024     # above this, force >=2 grid steps (v7x 2 TCs)


def _vmem_caps():
    """Generation-aware VMEM budget (working-set cap) and vmem_limit_bytes."""
    cap = 64 * 1024 * 1024             # conservative default (v7x per-TC VMEM)
    try:
        info = pltpu.get_tpu_info()
        cap = int(getattr(info, "vmem_capacity_bytes", cap)) or cap
    except Exception:
        pass
    budget = (cap * 3) // 5            # ~60% for the (1+G)x2 double-buffered tiles
    limit = (cap * 17) // 20           # ~85%: headroom for Mosaic scratch / padding
    return budget, limit


def _lane_dense_view(total_elems: int):
    """Factor the flat element count as (rows, cols) with cols a multiple of 128."""
    cap = min(total_elems, _MAX_LANES_PER_ROW)
    cols = 0
    c = _LANE
    while c <= cap:
        if total_elems % c == 0:
            cols = c
        c += _LANE
    if cols:
        return total_elems // cols, cols
    return None


def _choose_rows(rows, cols, itemsize, num_live, budget, total_bytes):
    """Byte-based row-tile selection for a full-width (lane-dense) block."""
    row_bytes = max(cols * itemsize, 1)
    max_rows_budget = max(budget // (row_bytes * num_live), 1)
    if max_rows_budget >= rows:
        # Whole tensor fits: keep >=2 balanced steps for non-trivial inputs so
        # both v7x TensorCores share the copy; genuinely tiny tensors stay 1-step.
        if total_bytes >= _MIN_SPLIT_BYTES and rows >= 2 * _SUBLANE:
            half = (rows + 1) // 2
            return min(rows, ((half + _SUBLANE - 1) // _SUBLANE) * _SUBLANE)
        return rows
    target_rows = max(_TARGET_TILE_BYTES // row_bytes, _SUBLANE)
    br = min(target_rows, max_rows_budget, rows)
    return max((br // _SUBLANE) * _SUBLANE, _SUBLANE)


def _choose_tiles_fallback(rows, cols, itemsize, num_live, budget):
    """Fallback when element count has no multiple-of-128 factorization."""
    row_bytes = cols * itemsize
    if row_bytes * _SUBLANE * num_live <= budget:
        br = _choose_rows(rows, cols, itemsize, num_live, budget, rows * row_bytes)
        return br, cols
    # Extremely wide rows: tile the lane axis too (>=512 lanes keeps DMA runs fat).
    max_cols = budget // (_SUBLANE * itemsize * num_live)
    bc = max((max_cols // _LANE) * _LANE, 4 * _LANE)
    bc = min(bc, cols)
    return min(rows, _SUBLANE), bc


def fork_pallas(x_full: jnp.ndarray, num_groups: int):
    """Produce `num_groups` physical copies of x_full via one Pallas kernel."""
    if num_groups <= 0:
        return ()

    orig_shape = x_full.shape
    orig_dtype = x_full.dtype
    is_complex = jnp.issubdtype(orig_dtype, jnp.complexfloating)
    if is_complex:
        # TODO(synk): lax.bitcast_convert_type rejects complex dtypes, so a truly
        # free complex<->real bitcast is unavailable at the JAX level; one
        # interleave pass (real/imag -> trailing pair) is paid here at the native
        # float width (no precision loss).
        x_work = jnp.stack([jnp.real(x_full), jnp.imag(x_full)], axis=-1)
    else:
        x_work = x_full

    work_shape = x_work.shape
    itemsize = jnp.dtype(x_work.dtype).itemsize
    total = int(x_work.size)
    total_bytes = total * itemsize
    num_live = (1 + num_groups) * 2          # double-buffered input + outputs
    budget, vmem_limit = _vmem_caps()

    view = _lane_dense_view(total)
    if view is not None:
        rows, cols = view
        br = _choose_rows(rows, cols, itemsize, num_live, budget, total_bytes)
        bc = cols
    else:
        rows = int(work_shape[0]) * int(work_shape[1]) if len(work_shape) >= 2 else 1
        cols = total // rows
        br, bc = _choose_tiles_fallback(rows, cols, itemsize, num_live, budget)

    x2d = x_work.reshape(rows, cols)

    if bc == cols:
        grid = (pl.cdiv(rows, br),)
        spec = pl.BlockSpec((br, cols), lambda i: (i, 0))
        dims = ("parallel",)
    else:
        grid = (pl.cdiv(rows, br), pl.cdiv(cols, bc))
        spec = pl.BlockSpec((br, bc), lambda i, j: (i, j))
        dims = ("parallel", "parallel")

    out_shapes = tuple(
        jax.ShapeDtypeStruct((rows, cols), x2d.dtype) for _ in range(num_groups)
    )

    outs = pl.pallas_call(
        _fork_kernel,
        out_shape=out_shapes,
        grid=grid,
        in_specs=[spec],
        out_specs=tuple(spec for _ in range(num_groups)),
        compiler_params=pltpu.CompilerParams(
            dimension_semantics=dims,
            vmem_limit_bytes=int(vmem_limit),
        ),
        cost_estimate=pl.CostEstimate(
            flops=0,
            transcendentals=0,
            bytes_accessed=(1 + num_groups) * total_bytes,
        ),
    )(x2d)
    if not isinstance(outs, (tuple, list)):
        outs = (outs,)

    results = []
    for o in outs:
        ow = o.reshape(work_shape)
        if is_complex:
            results.append(jax.lax.complex(ow[..., 0], ow[..., 1]).astype(orig_dtype))
        else:
            results.append(ow)
    return tuple(results)


# --------------------------------- Forker -------------------------------------
class Forker:
    """Fork its input into different named groups (JAX/Pallas version).

    The PyTorch forward returns the *same* SplitTensor for every group.  Since
    JAX arrays are immutable, the default path replicates that exactly with
    zero HBM traffic.  With materialize=True (e.g. a downstream op donates /
    aliases a group's buffer), one Pallas kernel produces physical copies for
    groups 1..G-1 while group 0 reuses the original buffer, cutting HBM traffic
    from (1 read + G writes) to (1 read + (G-1) writes).
    """

    def __init__(self, input_type: SplitTensorType, group_names: List[str],
                 materialize: bool = False):
        self.input_type = input_type
        self.group_names = list(group_names)
        self.output_type = {g: self.input_type for g in self.group_names}
        self.materialize = materialize

    def __call__(self, x: SplitTensor) -> Dict[str, SplitTensor]:
        if not self.materialize:
            # Exact PyTorch semantics: same (immutable) object for every group.
            return {g: x for g in self.group_names}
        full = x.full_view()
        groups = dict(x.num_channels)
        out = {self.group_names[0]: SplitTensor(full, groups=groups)}
        copies = fork_pallas(full, len(self.group_names) - 1)
        for g, c in zip(self.group_names[1:], copies):
            out[g] = SplitTensor(c, groups=groups)
        return out


# ---------------------------------- main ---------------------------------------
if __name__ == "__main__":
    key = jax.random.PRNGKey(0)

    # Small shapes consistent with the module: batch=2, channels split into two
    # groups (1 + 3 = 4 channels), spatial 16x16.
    N, H, W = 2, 16, 16
    groups = {"low": 1, "high": 3}
    input_type = SplitTensorType(groups, spatial_shape=(H, W), complex=False)

    C = input_type.num_channels
    x_full = jax.random.normal(key, (N, C, H, W), dtype=jnp.float32)
    x = SplitTensor(x_full, groups=groups)

    group_names = ["branch_a", "branch_b", "branch_c"]
    ok = True

    # 1) Default (zero-copy) path — exact PyTorch semantics.
    forker_nocopy = Forker(input_type, group_names)
    out_nc = forker_nocopy(x)
    ok &= all(out_nc[g] is x for g in group_names)

    # 2) Materializing path — exercises the Pallas fork kernel (real dtype).
    forker = Forker(input_type, group_names, materialize=True)
    out = forker(x)
    for g in group_names:
        y = out[g].full_view()
        jax.block_until_ready(y)
        ok &= bool(jnp.array_equal(y, x_full))
        ok &= out[g].num_channels == x.num_channels

    # 3) Complex path (complex64) through the same kernel.
    kc = jax.random.PRNGKey(1)
    xr = jax.random.normal(kc, (N, C, H, W), dtype=jnp.float32)
    xi = jax.random.normal(jax.random.fold_in(kc, 1), (N, C, H, W), dtype=jnp.float32)
    xc = (xr + 1j * xi).astype(jnp.complex64)
    for yc in fork_pallas(xc, 2):
        jax.block_until_ready(yc)
        ok &= bool(jnp.array_equal(yc, xc))
        ok &= yc.dtype == xc.dtype

    if ok:
        print("KERNEL_OK")
    else:
        raise SystemExit("forked outputs do not match input")
</pallas_src>

<mosaic_0001>
module attributes {stable_mosaic.version = 11 : i64} {
  func.func @_fork_kernel(%arg0: i32, %arg1: memref<1x2048xf32, #tpu.memory_space<vmem>>, %arg2: memref<1x2048xf32, #tpu.memory_space<vmem>>, %arg3: memref<1x2048xf32, #tpu.memory_space<vmem>>) attributes {dimension_semantics = [#tpu.dimension_semantics<parallel>], iteration_bounds = array<i64: 1>, scalar_prefetch = 0 : i64, scratch_operands = 0 : i64, tpu.core_type = #tpu.core_type<tc>, window_params = [{transform_indices = @transform_0, window_bounds = array<i64: 1, 2048>}, {transform_indices = @transform_1, window_bounds = array<i64: 1, 2048>}, {transform_indices = @transform_2, window_bounds = array<i64: 1, 2048>}]} {
    %c0 = arith.constant 0 : index
    %c0_0 = arith.constant 0 : index
    %0 = vector.load %arg1[%c0, %c0_0] : memref<1x2048xf32, #tpu.memory_space<vmem>>, vector<1x2048xf32>
    %c0_1 = arith.constant 0 : index
    %c0_2 = arith.constant 0 : index
    %1 = vector.load %arg2[%c0_1, %c0_2] : memref<1x2048xf32, #tpu.memory_space<vmem>>, vector<1x2048xf32>
    tpu.vector_store %arg2[%c0_1, %c0_2], %0 {strides = array<i32>} : memref<1x2048xf32, #tpu.memory_space<vmem>>, vector<1x2048xf32>,
    %c0_3 = arith.constant 0 : index
    %c0_4 = arith.constant 0 : index
    %2 = vector.load %arg3[%c0_3, %c0_4] : memref<1x2048xf32, #tpu.memory_space<vmem>>, vector<1x2048xf32>
    tpu.vector_store %arg3[%c0_3, %c0_4], %0 {strides = array<i32>} : memref<1x2048xf32, #tpu.memory_space<vmem>>, vector<1x2048xf32>,
    return
  }
  func.func @transform_0(%arg0: i32) -> (i32, i32) {
    %c0_i32 = arith.constant 0 : i32
    %c0_i32_0 = arith.constant 0 : i32
    return %arg0, %c0_i32 : i32, i32
  }
  func.func @transform_1(%arg0: i32) -> (i32, i32) {
    %c0_i32 = arith.constant 0 : i32
    %c0_i32_0 = arith.constant 0 : i32
    return %arg0, %c0_i32 : i32, i32
  }
  func.func @transform_2(%arg0: i32) -> (i32, i32) {
    %c0_i32 = arith.constant 0 : i32
    %c0_i32_0 = arith.constant 0 : i32
    return %arg0, %c0_i32 : i32, i32
  }
}

</mosaic_0001>

<bundles_post_ra>
// kernel: tpu_custom_call.1
= control target key start
LH: loop header
LB: loop body
LE: loop exit
PB: predicated region body
PF: predicated region fallthrough
CT: control target
= control target key end

     0   :  { %8 = vsyncpa [#allocation3], 0  ;;  %s173_s0 = inlined_call_operand.hbm [shape: f32[1,2048], index: 0, kind: input, shape index: {}]   ;;  %s174_s1 = inlined_call_operand.hbm [shape: f32[1,2048], index: 1, kind: output, shape index: {0}]   ;;  %s175_s2 = inlined_call_operand.hbm [shape: f32[1,2048], index: 2, kind: output, shape index: {1}]  }
   0x1   :  { %9 = vsyncpa [#allocation4], 0 }
   0x2   :  { %10 = vsyncpa [#allocation7], 0  ;;  %s16_s11 = sshll.u32 %s173_s0, 4  ;;  %s146_s12 = smov [#allocation2]   ;;  %s17_s11 = int_to_ptr.hbm [resolvable:$true] %s16_s11 }
   0x3   :  { %s18_s13 = sshll.u32 %s146_s12, 4  ;;  %s19_s13 = int_to_ptr.vmem [resolvable:$true] %s18_s13 }
   0x4   :  { %21 = dma.hbm_to_vmem [thread:$0]  %s17_s11, 256, %s19_s13, [#allocation3]  }
   0x5   :  { %140 = dma.done.wait [#allocation3], 256  }
   0x6   :  { %141 = vsyncadd [#allocation3], 4294967040  ;;  %s147_s14 = smov [#allocation5]   ;;  %s39_s18 = sshll.u32 %s174_s1, 4  ;;  %v26_v0 = vld [vmem:[#allocation2] sm:$0xff]  ;;  %v27_v1 = vld [vmem:[#allocation2 + $0x8] sm:$0xff]  ;;  %s40_s18 = int_to_ptr.hbm [resolvable:$true] %s39_s18 }
   0x7   :  { %s37_s15 = sshll.u32 %s147_s14, 4  ;;  %s148_s19 = smov [#allocation6]   ;;  %28 = vst [vmem:[#allocation5] sm:$0xff] %v26_v0  ;;  %s38_s15 = int_to_ptr.vmem [resolvable:$true] %s37_s15 }
   0x8   :  { %s48_s20 = sshll.u32 %s148_s19, 4  ;;  %s50_s23 = sshll.u32 %s175_s2, 4  ;;  %30 = vst [vmem:[#allocation6] sm:$0xff] %v26_v0  ;;  %s49_s20 = int_to_ptr.vmem [resolvable:$true] %s48_s20  ;;  %s51_s23 = int_to_ptr.hbm [resolvable:$true] %s50_s23 }
   0x9   :  { %29 = vst [vmem:[#allocation5 + $0x8] sm:$0xff] %v27_v1 }
   0xa   :  { %31 = vst [vmem:[#allocation6 + $0x8] sm:$0xff] %v27_v1  ;;  %42 = dma.vmem_to_hbm [thread:$0]  %s38_s15, 256, %s40_s18, [#allocation4]  }
   0xb   :  { %53 = dma.vmem_to_hbm [thread:$0]  %s49_s20, 256, %s51_s23, [#allocation7]  }
   0xc   :  { %142 = dma.done.wait [#allocation4], 256  }
   0xd   :  { %143 = vsyncadd [#allocation4], 4294967040 }
   0xe   :  { %144 = dma.done.wait [#allocation7], 256  }
   0xf   :  { %145 = vsyncadd [#allocation7], 4294967040 }
  0x10   :  { %62 = vsyncpa [#allocation3], 1 }
  0x11   :  { %63 = vsyncpa [#allocation4], 1 }
  0x12   :  { %64 = vsyncpa [#allocation7], 1 }

</bundles_post_ra>
